<compile_context>
chip_gen: v6e
topology: v6e:2x2x1
jax: 0.10.0
libtpu: 0.0.40
codegen_flags: <defaults>
</compile_context>

<pallas_src>
import numpy as np
import jax
import jax.numpy as jnp
from jax.experimental import pallas as pl
from jax.experimental.pallas import tpu as pltpu


def _dropout1d_kernel(x_ref, m_ref, o_ref):
    # x_ref: (TS, TL) tile of the flattened (N*C, L) input.
    # m_ref: (TS, 1) per-row multiplier already in x.dtype (0 or 1/(1-p));
    #        lane-broadcast over TL.  Single multiply per element.
    o_ref[...] = x_ref[...] * m_ref[...]


def _block_byte_budget() -> int:
    # ~2 MiB blocks keep double-buffered in+out (~8 MiB) under v5e's 16 MiB
    # scoped-VMEM default; v6e/v7x (32 MiB scoped) afford ~4 MiB blocks, which
    # amortizes the ~0.35 us per-grid-step overhead better at 1.4-3.2 TB/s HBM.
    budget = 2 << 20
    try:
        kind = jax.devices()[0].device_kind.lower()
        if ("v6" in kind) or ("v7" in kind):
            budget = 4 << 20
    except Exception:
        pass
    return budget


def _choose_tiles(nc: int, l: int, itemsize: int):
    """Pick (TS, TL) for the flattened (nc, l) array.

    Rules (per perf review):
      * prefer TL = full L whenever a block with at least one sublane-group of
        rows fits the byte budget -> lane-dense unmasked stores, no ragged lane
        tail, fewer grid steps;
      * size blocks by a byte budget, not independent per-dim caps;
      * TS is a multiple of the packed sublane count (8 f32 / 16 bf16 / 32 int8)
        unless it equals the full row dim;
      * keep >= 2 row blocks for non-trivial sizes so megacore (v7x) can shard
        the "parallel" row axis across both TensorCores.
    """
    sub = max(8, 32 // itemsize)              # packed sublane granularity
    budget = _block_byte_budget()
    total_bytes = nc * l * itemsize

    if l * itemsize * min(nc, sub) <= budget:
        # Full-L blocks (lane-dense; no ragged lane tiles, no inner-L grid loop
        # unless unavoidable).
        tl = l
        cap_rows = max(sub, (budget // (l * itemsize)) // sub * sub)
        if nc <= cap_rows:
            ts = nc                            # single row block == full dim (legal)
            # Split the row axis when there is real work, so the "parallel" row
            # grid axis has >= 2 blocks (v7x megacore sharding; no-op on v5e/v6e).
            if nc >= 2 * sub and total_bytes > (1 << 20):
                half = (nc + 1) // 2
                ts = min(nc, ((half + sub - 1) // sub) * sub)
        else:
            ts = cap_rows                      # multiple of sub; last block partial
    else:
        # L too large for even a minimal full-row block: tile the lane axis in
        # multiples of 128 (rare path; only then can a ragged lane tail appear).
        ts = min(nc, sub)
        tl = (budget // (ts * itemsize)) // 128 * 128
        tl = max(128, min(tl, l))
    return ts, tl


def robust_dropout1d(x, *, p: float = 0.5, key=None, training: bool = True):
    """JAX wrapper mirroring Robust_Dropout1d.forward (non-inplace path).

    Pass a fresh `key` per training step for new masks (a fixed default key
    would reuse the same mask every call).
    """
    if p < 0.0 or p > 1.0:
        raise ValueError(f"Dropout probability has to be between 0 and 1, but got {p}")
    if not training:
        return x
    if x.ndim not in (2, 3):
        raise ValueError(f"Expected 2D or 3D input (got {x.ndim}D input)")
    if p == 0.0:
        return x
    if p >= 1.0:
        # Everything is dropped; avoid 1/(1-p) = inf -> NaN.
        return jnp.zeros_like(x)
    if key is None:
        key = jax.random.PRNGKey(0)

    orig_shape = x.shape
    if x.ndim == 3:
        N, C, L = x.shape
        nc = N * C
    else:
        N, L = x.shape
        nc = N
    x2 = x.reshape(nc, L)

    # Per-(N,C) keep decision folded with the inverted-dropout scale into one
    # multiplier (0 or 1/(1-p)), constant along L by construction.  Pre-cast to
    # x.dtype so the kernel does a single multiply (PyTorch also scales in the
    # working dtype).
    keep = jax.random.bernoulli(key, 1.0 - p, (nc,))
    mult = jnp.where(keep, 1.0 / (1.0 - p), 0.0).astype(x2.dtype).reshape(nc, 1)

    itemsize = jnp.dtype(x2.dtype).itemsize
    ts, tl = _choose_tiles(nc, L, itemsize)
    # L innermost (fastest-varying): the (TS, 1) multiplier block index is
    # constant across it, so its DMA is elided across inner steps.
    grid = (pl.cdiv(nc, ts), pl.cdiv(L, tl))

    out = pl.pallas_call(
        _dropout1d_kernel,
        out_shape=jax.ShapeDtypeStruct((nc, L), x2.dtype),
        grid=grid,
        in_specs=[
            pl.BlockSpec((ts, tl), lambda i, j: (i, j)),  # x tile
            pl.BlockSpec((ts, 1), lambda i, j: (i, 0)),   # per-row multiplier
        ],
        out_specs=pl.BlockSpec((ts, tl), lambda i, j: (i, j)),
        compiler_params=pltpu.CompilerParams(
            dimension_semantics=("parallel", "parallel")),
        cost_estimate=pl.CostEstimate(
            flops=nc * L,
            transcendentals=0,
            bytes_accessed=2 * nc * L * itemsize + nc * itemsize),
    )(x2, mult)

    return out.reshape(orig_shape)


if __name__ == "__main__":
    p = 0.5
    key0 = jax.random.PRNGKey(0)

    # ---- 3-D case: (N, C, L) = (2, 4, 16) -------------------------------------
    x3 = jax.random.normal(key0, (2, 4, 16), dtype=jnp.float32)
    mask_key = jax.random.PRNGKey(42)
    y3 = robust_dropout1d(x3, p=p, key=mask_key, training=True)
    jax.block_until_ready(y3)

    # Reference with the identical mask the wrapper draws.
    keep_ref = jax.random.bernoulli(mask_key, 1.0 - p, (2 * 4,))
    mult_ref = jnp.where(keep_ref, 1.0 / (1.0 - p), 0.0).reshape(2, 4, 1)
    expected3 = np.asarray(x3 * mult_ref)
    assert np.allclose(np.asarray(y3), expected3, atol=1e-6), "3-D dropout mismatch"

    # Invariant: each (n, c) row is fully dropped or fully scaled by 1/(1-p).
    y_np, x_np = np.asarray(y3), np.asarray(x3)
    for n in range(2):
        for c in range(4):
            row = y_np[n, c]
            assert np.allclose(row, 0.0) or np.allclose(
                row, x_np[n, c] / (1.0 - p), atol=1e-5), "mask not channel-wise"

    # ---- eval mode: identity ---------------------------------------------------
    y_eval = robust_dropout1d(x3, p=p, key=mask_key, training=False)
    jax.block_until_ready(y_eval)
    assert np.allclose(np.asarray(y_eval), np.asarray(x3))

    # ---- p = 1.0: all dropped, no NaNs ----------------------------------------
    y_all = robust_dropout1d(x3, p=1.0, key=mask_key, training=True)
    jax.block_until_ready(y_all)
    assert np.allclose(np.asarray(y_all), 0.0)

    # ---- 2-D case: (N, F) = (8, 32), mask per row ------------------------------
    x2 = jax.random.normal(jax.random.PRNGKey(1), (8, 32), dtype=jnp.float32)
    key2 = jax.random.PRNGKey(7)
    y2 = robust_dropout1d(x2, p=p, key=key2, training=True)
    jax.block_until_ready(y2)
    keep2 = jax.random.bernoulli(key2, 1.0 - p, (8,))
    mult2 = jnp.where(keep2, 1.0 / (1.0 - p), 0.0).reshape(8, 1)
    assert np.allclose(np.asarray(y2), np.asarray(x2 * mult2), atol=1e-6)

    # ---- larger case: full-L lane-dense blocks, split row axis (2 blocks),
    #      partial last row block (nc = 396 vs ts = 200) -------------------------
    xl = jax.random.normal(jax.random.PRNGKey(2), (4, 99, 700), dtype=jnp.float32)
    keyl = jax.random.PRNGKey(11)
    yl = robust_dropout1d(xl, p=0.25, key=keyl, training=True)
    jax.block_until_ready(yl)
    keepl = jax.random.bernoulli(keyl, 0.75, (4 * 99,))
    multl = jnp.where(keepl, 1.0 / 0.75, 0.0).reshape(4, 99, 1)
    assert np.allclose(np.asarray(yl), np.asarray(xl * multl), atol=1e-5)

    # ---- very long L: exercises the L-tiling fallback (v5e budget) or a
    #      multi-row-block full-L grid (v6e/v7x budget) --------------------------
    xh = jax.random.normal(jax.random.PRNGKey(3), (1, 9, 70000), dtype=jnp.float32)
    keyh = jax.random.PRNGKey(13)
    yh = robust_dropout1d(xh, p=0.5, key=keyh, training=True)
    jax.block_until_ready(yh)
    keeph = jax.random.bernoulli(keyh, 0.5, (9,))
    multh = jnp.where(keeph, 2.0, 0.0).reshape(1, 9, 1)
    assert np.allclose(np.asarray(yh), np.asarray(xh * multh), atol=1e-5)

    print("KERNEL_OK")
</pallas_src>

<mosaic_0001>
module attributes {stable_mosaic.version = 11 : i64} {
  func.func @_dropout1d_kernel(%arg0: i32, %arg1: i32, %arg2: memref<8x16xf32, #tpu.memory_space<vmem>>, %arg3: memref<8x1xf32, #tpu.memory_space<vmem>>, %arg4: memref<8x16xf32, #tpu.memory_space<vmem>>) attributes {dimension_semantics = [#tpu.dimension_semantics<parallel>, #tpu.dimension_semantics<parallel>], iteration_bounds = array<i64: 1, 1>, scalar_prefetch = 0 : i64, scratch_operands = 0 : i64, tpu.core_type = #tpu.core_type<tc>, window_params = [{transform_indices = @transform_0, window_bounds = array<i64: 8, 16>}, {transform_indices = @transform_1, window_bounds = array<i64: 8, 1>}, {transform_indices = @transform_2, window_bounds = array<i64: 8, 16>}]} {
    %c0 = arith.constant 0 : index
    %c0_0 = arith.constant 0 : index
    %0 = vector.load %arg2[%c0, %c0_0] : memref<8x16xf32, #tpu.memory_space<vmem>>, vector<8x16xf32>
    %c0_1 = arith.constant 0 : index
    %c0_2 = arith.constant 0 : index
    %1 = vector.load %arg3[%c0_1, %c0_2] : memref<8x1xf32, #tpu.memory_space<vmem>>, vector<8x1xf32>
    %2 = vector.broadcast %1 : vector<8x1xf32> to vector<8x16xf32>
    %3 = arith.mulf %0, %2 : vector<8x16xf32>
    %c0_3 = arith.constant 0 : index
    %c0_4 = arith.constant 0 : index
    %4 = vector.load %arg4[%c0_3, %c0_4] : memref<8x16xf32, #tpu.memory_space<vmem>>, vector<8x16xf32>
    tpu.vector_store %arg4[%c0_3, %c0_4], %3 {strides = array<i32>} : memref<8x16xf32, #tpu.memory_space<vmem>>, vector<8x16xf32>,
    return
  }
  func.func @transform_0(%arg0: i32, %arg1: i32) -> (i32, i32) {
    %c0_i32 = arith.constant 0 : i32
    return %arg0, %arg1 : i32, i32
  }
  func.func @transform_1(%arg0: i32, %arg1: i32) -> (i32, i32) {
    %c0_i32 = arith.constant 0 : i32
    %c0_i32_0 = arith.constant 0 : i32
    return %arg0, %c0_i32 : i32, i32
  }
  func.func @transform_2(%arg0: i32, %arg1: i32) -> (i32, i32) {
    %c0_i32 = arith.constant 0 : i32
    return %arg0, %arg1 : i32, i32
  }
}

</mosaic_0001>

<bundles_post_ra>
// kernel: tpu_custom_call.1
= control target key start
LH: loop header
LB: loop body
LE: loop exit
PB: predicated region body
PF: predicated region fallthrough
CT: control target
= control target key end

     0   :  { %s87_s0 = inlined_call_operand.vmem [shape: f32[8,16], index: 0, kind: input, shape index: {}]   ;;  %s88_s1 = inlined_call_operand.vmem [shape: f32[8,1], index: 1, kind: input, shape index: {}]   ;;  %s89_s2 = inlined_call_operand.hbm [shape: f32[8,16], index: 2, kind: output, shape index: {}]  }
   0x1   :  { %v13_v0 = vld [vmem:[%s88_s1] sm:$0xff] }
   0x2   :  { %7 = vsyncpa [#allocation3], 0  ;;  %v61_v1 = vmov 0   ;;  %v12_v2 = vld [vmem:[%s87_s0] sm:$0xff]  ;;  %s62_s13 = smov [#allocation2]   ;;  %vm20_vm0 = vcmask 130048  }
   0x3   :  { %38 = vset.pattern.permute.xlu0 %v61_v1  ;;  %s28_s14 = sshll.u32 %s62_s13, 4  ;;  %s29_s14 = int_to_ptr.vmem [resolvable:$true] %s28_s14 }
   0x4   :  { %16 = vperm.xlu0 %38, %v13_v0   ;;  %s39_s15 = scalar_lea.vmem %s29_s14, 128  ;;  %p44_p1 = scmp.lt.s32.totalorder %s29_s14, %s29_s14 }
   0x5   :  { %p40_p0 = scmp.ne.s32.totalorder %s29_s14, %s39_s15  ;;  %p45_p2 = scmp.lt.s32.totalorder %s39_s15, %s39_s15 }
   0x7   :  { %p46_p3 = por %p45_p2, %p44_p1 }
   0x9   :  { %p47_p4 = pnand %p46_p3, %p40_p0 }
  0x7f   :  { %v17_v3 = vpop.permute.xlu0 %16 }
  0x80   :  { %v19_v4 = vmul.f32 %v17_v3, %v12_v2 }
  0x82   :  { %21 = vst.msk [vmem:[#allocation2] sm:$0xff] %vm20_vm0, %v19_v4 }
  0x83   :  { %50 = shalt.err (!%p47_p4)
}
  0x84   :  { %31 = dma.vmem_to_hbm [thread:$0]  %s29_s14, 128, %s89_s2, [#allocation3]  }
  0x85   :  { %59 = dma.done.wait [#allocation3], 128  }
  0x86   :  { %60 = vsyncadd [#allocation3], 4294967168 }
  0x87   :  { %35 = vsyncpa [#allocation3], 1 }

</bundles_post_ra>
